<compile_context>
chip_gen: v5e
topology: v5e:2x2
jax: 0.10.0
libtpu: 0.0.40
codegen_flags: <defaults>
</compile_context>

<pallas_src>
import functools

import jax
import jax.numpy as jnp
from jax.experimental import pallas as pl
from jax.experimental.pallas import tpu as pltpu


def _group_std(xf, G, M, eps):
    """xf: (G*M, L) float32.  Group-wise std per group slot -> (M, L).

    Two-pass, centered: mu = mean over the group axis, then
    var = mean((x - mu)^2) (biased, matches torch .square().mean(0)),
    std = sqrt(var + eps)  (eps added before sqrt, as in the module).
    G is small and static, so the loops fully unroll.
    """
    inv_g = 1.0 / G
    s = xf[0:M, :]
    for g in range(1, G):                     # unrolled: first pass (group sum)
        s = s + xf[g * M:(g + 1) * M, :]
    mu = s * inv_g
    d = xf[0:M, :] - mu
    ss = d * d
    for g in range(1, G):                     # unrolled: second pass (centered SSQ)
        d = xf[g * M:(g + 1) * M, :] - mu
        ss = ss + d * d
    # NOTE: if VALU ever binds (large B, bf16 on v5e), this group reduction can be
    # moved to the otherwise-idle MXU as an (M x B) selection-matrix matmul.
    return jnp.sqrt(ss * inv_g + eps)


def _mbstd_fused_kernel(x_ref, o_ref, acc_ref, *, G, M, eps, inv_n, n_x_tiles):
    """Tiled, concat-fused kernel.

    x_ref:   (B, TN) input tile (clamped to the last x tile during stat steps,
             so the pipeline skips the re-fetch).
    o_ref:   (B, TN) output tile of the fused (B, n + H*W) result; the trailing
             stat block is partial and Pallas drops the OOB columns on writeback.
    acc_ref: (M, 1) f32 running lane-sum of the group-wise std.
    """
    j = pl.program_id(0)

    @pl.when(j == 0)
    def _init():
        acc_ref[...] = jnp.zeros_like(acc_ref)

    @pl.when(j < n_x_tiles)
    def _copy_and_accumulate():
        x = x_ref[...]
        o_ref[...] = x                                       # fused pass-through of x
        std = _group_std(x.astype(jnp.float32), G, M, eps)   # (M, TN)
        # Reduce over lanes immediately (XLU): scratch stays (M, 1), independent of TN.
        acc_ref[...] += jnp.sum(std, axis=1, keepdims=True)

    @pl.when(j >= n_x_tiles)
    def _write_stat_channel():
        stat = acc_ref[...] * inv_n                          # (M, 1) mean over C*H*W
        rep = jnp.tile(stat, (G, 1))                         # (B, 1): row b -> slot b % M
        o_ref[...] = jnp.broadcast_to(rep, o_ref.shape).astype(o_ref.dtype)


def _mbstd_single_block_kernel(x_ref, o_ref, *, G, M, eps, n):
    """Fallback only for n = C*H*W not a multiple of 128 (tiny, odd layers):
    one grid step, full-dim blocks, still concat-fused and two-pass centered."""
    B = o_ref.shape[0]
    hw = o_ref.shape[1] - n
    x = x_ref[...]
    o_ref[:, :n] = x
    std = _group_std(x.astype(jnp.float32), G, M, eps)       # (M, n)
    stat = jnp.mean(std, axis=1, keepdims=True)              # (M, 1)
    rep = jnp.tile(stat, (G, 1))                              # (B, 1)
    o_ref[:, n:] = jnp.broadcast_to(rep, (B, hw)).astype(o_ref.dtype)


def _pick_lane_tile(n, B, in_itemsize, out_itemsize,
                    budget_bytes=32 * 1024 * 1024, max_lanes=65536):
    """Largest multiple-of-128 divisor of n whose pipelined VMEM footprint
    (2x input + 2x output double buffers + ~2x f32 compute temporaries) stays
    under budget_bytes.  Budget is sized for v7x's 64 MiB VMEM so the same
    heuristic is also safe on v5e/v6e (128 MiB).  Returns None when n is not a
    multiple of 128 (use the single-block fallback)."""
    if n % 128 != 0:
        return None
    bytes_per_lane = B * (2 * in_itemsize + 2 * out_itemsize + 2 * 4)
    cap = min(max_lanes, max(128, (budget_bytes // bytes_per_lane) // 128 * 128))
    best = 128
    tn = 128
    while tn <= cap:
        if n % tn == 0:
            best = tn
        tn += 128
    return best


def minibatch_stddev(x, group_size=4, eps=1e-4):
    """Forward pass of MiniBatchStdDev: returns (B, C+1, H, W)."""
    B, C, H, W = x.shape
    G = group_size if B % group_size == 0 else B     # torch _check_group_size
    M = B // G                                       # samples per group slot
    hw = H * W
    n = C * hw

    x2 = x.reshape(B, n)
    out_shape = jax.ShapeDtypeStruct((B, n + hw), x.dtype)
    cparams = pltpu.CompilerParams(
        dimension_semantics=("arbitrary",),          # sequential: accumulator carry
        vmem_limit_bytes=48 * 1024 * 1024)           # <= v7x physical (64 MiB); fine on v5e/v6e

    tn = _pick_lane_tile(n, B, x.dtype.itemsize, x.dtype.itemsize)
    if tn is None:
        kernel = functools.partial(_mbstd_single_block_kernel,
                                   G=G, M=M, eps=eps, n=n)
        out = pl.pallas_call(
            kernel,
            out_shape=out_shape,
            grid_spec=pltpu.PrefetchScalarGridSpec(
                num_scalar_prefetch=0,
                grid=(1,),
                in_specs=[pl.BlockSpec((B, n), lambda i: (0, 0))],
                out_specs=pl.BlockSpec((B, n + hw), lambda i: (0, 0))),
            compiler_params=cparams,
        )(x2)
    else:
        n_x_tiles = n // tn                          # tiles covering x exactly
        n_tiles = n_x_tiles + (-(-hw // tn))         # + trailing stat tile(s), partial OK
        kernel = functools.partial(_mbstd_fused_kernel, G=G, M=M, eps=eps,
                                   inv_n=1.0 / n, n_x_tiles=n_x_tiles)
        out = pl.pallas_call(
            kernel,
            out_shape=out_shape,
            grid_spec=pltpu.PrefetchScalarGridSpec(
                num_scalar_prefetch=0,
                grid=(n_tiles,),
                # Trailing stat step(s): clamp the input block index to the last x
                # tile -> same block index as the previous step -> no extra fetch.
                in_specs=[pl.BlockSpec(
                    (B, tn), lambda j: (0, jnp.minimum(j, n_x_tiles - 1)))],
                out_specs=pl.BlockSpec((B, tn), lambda j: (0, j)),
                scratch_shapes=[pltpu.VMEM((M, 1), jnp.float32)]),
            compiler_params=cparams,
        )(x2)

    return out.reshape(B, C + 1, H, W)


def _reference(x, group_size=4, eps=1e-4):
    """Pure-JAX port of the PyTorch forward (f32 internals), for checking."""
    B, C, H, W = x.shape
    G = group_size if B % group_size == 0 else B
    y = x.astype(jnp.float32).reshape(G, -1, C, H, W)
    y = y - jnp.mean(y, axis=0, keepdims=True)
    y = jnp.mean(jnp.square(y), axis=0)
    y = jnp.sqrt(y + eps)
    y = jnp.mean(y, axis=(1, 2, 3), keepdims=True)   # (M,1,1,1)
    y = jnp.tile(y, (G, 1, H, W)).astype(x.dtype)    # (B,1,H,W)
    return jnp.concatenate([x, y], axis=1)


if __name__ == "__main__":
    key = jax.random.PRNGKey(0)
    cases = [
        # (shape, dtype, group_size, tol)
        ((8, 4, 16, 16), jnp.float32, 4, 2e-5),    # hw=256: tiled path, M=2
        ((8, 64, 4, 4), jnp.bfloat16, 4, 2e-2),    # hw=16 < 128, n=1024: tiled path + partial stat tail, bf16
        ((6, 3, 5, 5), jnp.float32, 4, 2e-5),      # B%4!=0 -> G=B; n=75 not 128-aligned -> fallback path
    ]
    ok = True
    for shape, dtype, gs, tol in cases:
        key, sub = jax.random.split(key)
        x = jax.random.normal(sub, shape, dtype=jnp.float32).astype(dtype)
        out = jax.block_until_ready(minibatch_stddev(x, group_size=gs, eps=1e-4))
        ref = _reference(x, group_size=gs, eps=1e-4)
        ok = ok and (out.shape == ref.shape)
        ok = ok and bool(jnp.allclose(out.astype(jnp.float32),
                                      ref.astype(jnp.float32),
                                      atol=tol, rtol=tol))
    assert ok, "mismatch vs reference"
    print("KERNEL_OK")
</pallas_src>

<mosaic_0001>
module attributes {stable_mosaic.version = 11 : i64} {
  func.func @_mbstd_fused_kernel(%arg0: i32, %arg1: memref<8x1024xf32, #tpu.memory_space<vmem>>, %arg2: memref<8x1024xf32, #tpu.memory_space<vmem>>, %arg3: memref<2x1xf32, #tpu.memory_space<vmem>>) attributes {dimension_semantics = [#tpu.dimension_semantics<arbitrary>], iteration_bounds = array<i64: 2>, scalar_prefetch = 0 : i64, scratch_operands = 1 : i64, tpu.core_type = #tpu.core_type<tc>, window_params = [{transform_indices = @transform_0, window_bounds = array<i64: 8, 1024>}, {transform_indices = @transform_1, window_bounds = array<i64: 8, 1024>}]} {
    %c0_i32 = arith.constant 0 : i32
    %0 = arith.cmpi eq, %arg0, %c0_i32 : i32
    %1 = arith.extui %0 : i1 to i32
    %c0_i32_0 = arith.constant 0 : i32
    %2 = arith.cmpi ne, %1, %c0_i32_0 : i32
    scf.if %2 {
      %cst = arith.constant 0.000000e+00 : f32
      %9 = vector.broadcast %cst : f32 to vector<2x1xf32>
      %c0 = arith.constant 0 : index
      %c0_4 = arith.constant 0 : index
      %10 = vector.load %arg3[%c0, %c0_4] : memref<2x1xf32, #tpu.memory_space<vmem>>, vector<2x1xf32>
      tpu.vector_store %arg3[%c0, %c0_4], %9 {strides = array<i32>} : memref<2x1xf32, #tpu.memory_space<vmem>>, vector<2x1xf32>,
    } else {
    }
    %c1_i32 = arith.constant 1 : i32
    %3 = arith.cmpi slt, %arg0, %c1_i32 : i32
    %4 = arith.extui %3 : i1 to i32
    %c0_i32_1 = arith.constant 0 : i32
    %5 = arith.cmpi ne, %4, %c0_i32_1 : i32
    scf.if %5 {
      %c0 = arith.constant 0 : index
      %c0_4 = arith.constant 0 : index
      %9 = vector.load %arg1[%c0, %c0_4] : memref<8x1024xf32, #tpu.memory_space<vmem>>, vector<8x1024xf32>
      %c0_5 = arith.constant 0 : index
      %c0_6 = arith.constant 0 : index
      %10 = vector.load %arg2[%c0_5, %c0_6] : memref<8x1024xf32, #tpu.memory_space<vmem>>, vector<8x1024xf32>
      tpu.vector_store %arg2[%c0_5, %c0_6], %9 {strides = array<i32>} : memref<8x1024xf32, #tpu.memory_space<vmem>>, vector<8x1024xf32>,
      %11 = vector.extract_strided_slice %9 {offsets = [0, 0], sizes = [2, 1024], strides = [1, 1]} : vector<8x1024xf32> to vector<2x1024xf32>
      %12 = vector.extract_strided_slice %9 {offsets = [2, 0], sizes = [2, 1024], strides = [1, 1]} : vector<8x1024xf32> to vector<2x1024xf32>
      %13 = arith.addf %11, %12 : vector<2x1024xf32>
      %14 = vector.extract_strided_slice %9 {offsets = [4, 0], sizes = [2, 1024], strides = [1, 1]} : vector<8x1024xf32> to vector<2x1024xf32>
      %15 = arith.addf %13, %14 : vector<2x1024xf32>
      %16 = vector.extract_strided_slice %9 {offsets = [6, 0], sizes = [2, 1024], strides = [1, 1]} : vector<8x1024xf32> to vector<2x1024xf32>
      %17 = arith.addf %15, %16 : vector<2x1024xf32>
      %cst = arith.constant 2.500000e-01 : f32
      %18 = vector.broadcast %cst : f32 to vector<2x1024xf32>
      %19 = arith.mulf %17, %18 : vector<2x1024xf32>
      %20 = vector.extract_strided_slice %9 {offsets = [0, 0], sizes = [2, 1024], strides = [1, 1]} : vector<8x1024xf32> to vector<2x1024xf32>
      %21 = arith.subf %20, %19 : vector<2x1024xf32>
      %22 = arith.mulf %21, %21 : vector<2x1024xf32>
      %23 = vector.extract_strided_slice %9 {offsets = [2, 0], sizes = [2, 1024], strides = [1, 1]} : vector<8x1024xf32> to vector<2x1024xf32>
      %24 = arith.subf %23, %19 : vector<2x1024xf32>
      %25 = arith.mulf %24, %24 : vector<2x1024xf32>
      %26 = arith.addf %22, %25 : vector<2x1024xf32>
      %27 = vector.extract_strided_slice %9 {offsets = [4, 0], sizes = [2, 1024], strides = [1, 1]} : vector<8x1024xf32> to vector<2x1024xf32>
      %28 = arith.subf %27, %19 : vector<2x1024xf32>
      %29 = arith.mulf %28, %28 : vector<2x1024xf32>
      %30 = arith.addf %26, %29 : vector<2x1024xf32>
      %31 = vector.extract_strided_slice %9 {offsets = [6, 0], sizes = [2, 1024], strides = [1, 1]} : vector<8x1024xf32> to vector<2x1024xf32>
      %32 = arith.subf %31, %19 : vector<2x1024xf32>
      %33 = arith.mulf %32, %32 : vector<2x1024xf32>
      %34 = arith.addf %30, %33 : vector<2x1024xf32>
      %cst_7 = arith.constant 2.500000e-01 : f32
      %35 = vector.broadcast %cst_7 : f32 to vector<2x1024xf32>
      %36 = arith.mulf %34, %35 : vector<2x1024xf32>
      %cst_8 = arith.constant 9.99999974E-5 : f32
      %37 = vector.broadcast %cst_8 : f32 to vector<2x1024xf32>
      %38 = arith.addf %36, %37 : vector<2x1024xf32>
      %39 = math.sqrt %38 : vector<2x1024xf32>
      %c0_9 = arith.constant 0 : index
      %c0_10 = arith.constant 0 : index
      %40 = vector.load %arg3[%c0_9, %c0_10] : memref<2x1xf32, #tpu.memory_space<vmem>>, vector<2x1xf32>
      %cst_11 = arith.constant dense<0.000000e+00> : vector<2xf32>
      %41 = vector.multi_reduction <add>, %39, %cst_11 [1] : vector<2x1024xf32> to vector<2xf32>
      %42 = vector.shape_cast %41 : vector<2xf32> to vector<2x1xf32>
      %43 = arith.addf %40, %42 : vector<2x1xf32>
      %c0_12 = arith.constant 0 : index
      %c0_13 = arith.constant 0 : index
      %44 = vector.load %arg3[%c0_12, %c0_13] : memref<2x1xf32, #tpu.memory_space<vmem>>, vector<2x1xf32>
      tpu.vector_store %arg3[%c0_12, %c0_13], %43 {strides = array<i32>} : memref<2x1xf32, #tpu.memory_space<vmem>>, vector<2x1xf32>,
    } else {
    }
    %c1_i32_2 = arith.constant 1 : i32
    %6 = arith.cmpi sge, %arg0, %c1_i32_2 : i32
    %7 = arith.extui %6 : i1 to i32
    %c0_i32_3 = arith.constant 0 : i32
    %8 = arith.cmpi ne, %7, %c0_i32_3 : i32
    scf.if %8 {
      %c0 = arith.constant 0 : index
      %c0_4 = arith.constant 0 : index
      %9 = vector.load %arg3[%c0, %c0_4] : memref<2x1xf32, #tpu.memory_space<vmem>>, vector<2x1xf32>
      %cst = arith.constant 9.765625E-4 : f32
      %10 = vector.broadcast %cst : f32 to vector<2x1xf32>
      %11 = arith.mulf %9, %10 : vector<2x1xf32>
      %12 = tpu.concatenate %11, %11, %11, %11 in 0 : vector<2x1xf32>, vector<2x1xf32>, vector<2x1xf32>, vector<2x1xf32> -> vector<8x1xf32>
      %13 = vector.shape_cast %12 : vector<8x1xf32> to vector<8x1xf32>
      %14 = vector.broadcast %13 : vector<8x1xf32> to vector<8x1024xf32>
      %c0_5 = arith.constant 0 : index
      %c0_6 = arith.constant 0 : index
      %15 = vector.load %arg2[%c0_5, %c0_6] : memref<8x1024xf32, #tpu.memory_space<vmem>>, vector<8x1024xf32>
      tpu.vector_store %arg2[%c0_5, %c0_6], %14 {strides = array<i32>} : memref<8x1024xf32, #tpu.memory_space<vmem>>, vector<8x1024xf32>,
    } else {
    }
    return
  }
  func.func @transform_0(%arg0: i32) -> (i32, i32) {
    %c0_i32 = arith.constant 0 : i32
    %0 = arith.minsi %arg0, %c0_i32 : i32
    %c0_i32_0 = arith.constant 0 : i32
    %c0_i32_1 = arith.constant 0 : i32
    return %c0_i32_0, %0 : i32, i32
  }
  func.func @transform_1(%arg0: i32) -> (i32, i32) {
    %c0_i32 = arith.constant 0 : i32
    %c0_i32_0 = arith.constant 0 : i32
    return %c0_i32, %arg0 : i32, i32
  }
}

</mosaic_0001>

<bundles_post_ra>
// kernel: tpu_custom_call.1
= control target key start
LH: loop header
LB: loop body
LE: loop exit
PB: predicated region body
PF: predicated region fallthrough
CT: control target
= control target key end

     0   :  { %6 = vsyncpa [#allocation4], 0  ;;  %s1440_s0 = inlined_call_operand.hbm [shape: f32[8,1024], index: 0, kind: input, shape index: {}]   ;;  %s1441_s1 = inlined_call_operand.hbm [shape: f32[8,1280], index: 1, kind: output, shape index: {}]  }
   0x1   :  { %8 = vsyncpa [#allocation4 + $0x1], 0 }
   0x2   :  { %9 = vsyncpa [#allocation5], 0 }
   0x3   :  { %11 = vsyncpa [#allocation5 + $0x1], 0  ;;  %s996_s6 = smov 0   ;;  %s998_s7 = smov 0  }
   0x4   :  { %s1000_s8 = smov 0   ;;  %s1002_s9 = smov 0  }
   0x5   :  { %s1004_s10 = smov 0   ;;  %s1006_s11 = smov 0  }
   0x6   :  { %s1008_s12 = smov 0  }
   0x7 LB: > { %s1030_s13 = sadd.s32 4294967295, %s981_s12   ;;  %s739_s14 = sadd.s32 4294967294, %s981_s12   ;;  %s981_s12 = sphi %s1008_s12, %s1455_s12   ;;  %s977_s11 = sphi %s1006_s11, %s1454_s11   ;;  %s973_s10 = sphi %s1004_s10, %s1453_s10   ;;  %s969_s9 = sphi %s1002_s9, %s1452_s9   ;;  %s965_s8 = sphi %s1000_s8, %s1451_s8   ;;  %s961_s7 = sphi %s998_s7, %s1450_s7   ;;  %s957_s6 = sphi %s996_s6, %s1449_s6  }
   0x8   : > { %s1034_s15 = sadd.s32 1, %s981_s12   ;;  %p21_p0 = scmp.lt.s32.totalorder %s981_s12, 0 }
   0x9   : > { %p23_p1 = scmp.lt.s32.totalorder %s1034_s15, 0  ;;  %s28_s16 = sadd.s32 1, %s977_s11 }
   0xa   : > { %s22_s17 = scalar_select %p21_p0, %s981_s12, 0 }
   0xb   : > { %s24_s18 = scalar_select %p23_p1, %s1034_s15, 0 }
   0xc   : > { %p35_p2 = scmp.ne.s32.totalorder %s977_s11, %s973_s10  ;;  %p36_p3 = scmp.eq.s32.totalorder %s981_s12, 0 }
   0xd   : > { %s25_s19 = ssub.s32 %s22_s17, %s24_s18  ;;  %p41_p4 = scmp.ne.s32.totalorder %s973_s10, %s969_s9 }
   0xe   : > { %p26_p5 = scmp.eq.s32.totalorder %s25_s19, 0  ;;  %p1045_p6 = por %p36_p3, %p35_p2 }
   0xf   : > { %p42_p7 = scmp.eq.s32.totalorder %s1030_s13, 0  ;;  %s51_s21 = ssub.s32 %s981_s12, %s1034_s15 }
  0x10   : > { %s1053_s22 = scalar_select %p26_p5, %s977_s11, %s28_s16  }
  0x11   : > { %p1055_p8 = por %p42_p7, %p41_p4  ;;  %p52_p9 = scmp.eq.s32.totalorder %s51_s21, 0 }
  0x12   : > { %s54_s24 = sadd.s32 1, %s965_s8  ;;  %p64_p10 = scmp.ne.s32.totalorder %s965_s8, %s961_s7 }
  0x13   : > { %s1063_s25 = scalar_select %p52_p9, %s965_s8, %s54_s24  }
  0x14   : > { %p65_p11 = scmp.eq.s32.totalorder %s1030_s13, 1  ;;  %p70_p12 = scmp.ne.s32.totalorder %s961_s7, %s957_s6 }
  0x15   : > { %p71_p13 = scmp.eq.s32.totalorder %s739_s14, 1  ;;  %p773_p2 = scmp.lt.s32.totalorder %s981_s12, 2 }
  0x16   : > { %p1069_p1 = por %p65_p11, %p64_p10  ;;  %s91_s28 = sand.u32 1, %s977_s11  }
  0x17   : > { %p1074_p3 = por %p71_p13, %p70_p12  ;;  %s742_s29 = sshll.u32 %s91_s28, 6 }
  0x18   : > { %s760_s30 = sshll.u32 %s22_s17, 6  ;;  %s95_s5 = scalar_lea.vmem [#allocation3], %s742_s29 }
  0x19   : > { %s102_s4 = scalar_lea.hbm %s1440_s0, %s760_s30  ;;  %s106_s9 = sshll.u32 %s95_s5, 4  ;;  %s107_s9 = int_to_ptr.vmem [resolvable:$true] %s106_s9 }
  0x1a   : > { %s104_s14 = sshll.u32 %s102_s4, 4  ;;  %p1084_p4 = pnand %p773_p2, %p1045_p6  ;;  %s105_s14 = int_to_ptr.hbm [resolvable:$true] %s104_s14 }
  0x1b   : > { %p745_p5 = scmp.ge.s32.totalorder %s981_s12, 1  ;;  %p111_p7 = scmp.lt.s32.totalorder %s981_s12, 3 }
  0x1c   : > { %s92_s18 = scalar_lea.sflag [#allocation4], %s91_s28  ;;  %s850_s19 = sshra.s32 %s105_s14, 4  ;;  %s851_s19 = int_to_ptr.hbm [resolvable:$true] %s850_s19 }
  0x1d   : > { %s852_s17 = scalar_lea.hbm %s851_s19, 64  ;;  %p854_p10 = pneg %p1084_p4 }
  0x1e   : > { %p853_p9 = scmp.ne.s32.totalorder %s851_s19, %s852_s17  ;;  %s857_s20 = scalar_lea.hbm %s1440_s0, 64 }
  0x1f   : > { %p858_p6 = scmp.lt.s32.totalorder %s851_s19, %s1440_s0  ;;  %p859_p13 = scmp.lt.s32.totalorder %s857_s20, %s852_s17 }
  0x20   : > { %p855_p11 = pnand %p854_p10, %p853_p9 }
  0x21   : > { %p860_p2 = por %p859_p13, %p858_p6 }
  0x22   : > { %p856_p12 = pneg %p855_p11 }
  0x24   : > { %p861_p0 = pnand %p860_p2, %p856_p12 }
  0x26   : > { %864 = shalt.err (!%p861_p0)
}
  0x27   : > { %768 = dma.hbm_to_vmem [thread:$0]  (!%p1084_p4), %s105_s14, 1024, %s107_s9, %s92_s18  }
  0x28   : > { %p112_p9 = pnand %p745_p5, %p111_p7 }
  0x29   : > { %s117_s28 = sand.u32 (!%p112_p9), 1, %s973_s10  }
  0x2a   : > { %115 = sbr.rel (%p112_p9) target bundleno = 448 (0x1c0), region = 24  ;;  %s746_s2 = sshll.u32 (!%p112_p9), %s117_s28, 6 }
  0x2b   : > { %s118_s3 = scalar_lea.sflag (!%p112_p9), [#allocation4], %s117_s28  ;;  %s121_s4 = scalar_lea.vmem (!%p112_p9), [#allocation3], %s746_s2 }
  0x2f   : > { %948 = dma.done.wait (%p1055_p8), %s118_s3, 1024  }
  0x30   : > { %950 = vsyncadd (%p1055_p8), %s118_s3, 4294966272  ;;  %s138_s5 = sand.u32 1, %s961_s7   ;;  %p748_p0 = scmp.ne.s32.totalorder %s1030_s13, 0 }
  0x31   : > { %s747_s9 = sshll.u32 %s138_s5, 6 }
  0x32   : > { %s1112_s14 = scalar_lea.vmem [#allocation6], %s747_s9  ;;  %152 = sbr.rel (%p748_p0) target bundleno = 57 (0x39), region = 32 }
  0x37   : > { %vm153_vm0 = vcmask 1024   ;;  %v983_v0 = vmov 0.0  }
  0x38   : > { %154 = vst.msk [vmem:[#allocation2] sm:$0x3] %vm153_vm0, %v983_v0 }
  0x39 PF: > { %p749_p4 = scmp.ge.s32.totalorder %s1030_s13, 1 }
  0x3b   : > { %158 = sbr.rel (%p749_p4) target bundleno = 275 (0x113), region = 36 }
  0x40   : > { %v1116_v1 = vld [vmem:[%s121_s4] sm:$0xff]  ;;  %v1118_v2 = vld [vmem:[%s121_s4 + $0x8] sm:$0xff]  ;;  %v1120_v3 = vld [vmem:[%s121_s4 + $0x10] sm:$0xff]  ;;  %vm592_vm12 = vcmask 1041408  }
  0x41   : > { %v1122_v4 = vld [vmem:[%s121_s4 + $0x18] sm:$0xff]  ;;  %v1124_v5 = vld [vmem:[%s121_s4 + $0x20] sm:$0xff]  ;;  %v1126_v6 = vld [vmem:[%s121_s4 + $0x28] sm:$0xff]  ;;  %167 = vst [vmem:[%s1112_s14] sm:$0xff] %v1116_v1  ;;  %v183_v7 = vrot.slane %v1116_v1, 2  ;;  %v184_v8 = vrot.slane %v1118_v2, 2  ;;  %v185_v9 = vrot.slane %v1120_v3, 2 }
  0x42   : > { %v1133_v10 = vld [vmem:[%s121_s4 + $0x30] sm:$0xff]  ;;  %v1135_v11 = vld [vmem:[%s121_s4 + $0x38] sm:$0xff]  ;;  %168 = vst [vmem:[%s1112_s14 + $0x8] sm:$0xff] %v1118_v2  ;;  %v186_v12 = vrot.slane %v1122_v4, 2  ;;  %v187_v13 = vrot.slane %v1124_v5, 2  ;;  %v188_v14 = vrot.slane %v1126_v6, 2 }
  0x43   : > { %169 = vst [vmem:[%s1112_s14 + $0x10] sm:$0xff] %v1120_v3  ;;  %v189_v15 = vrot.slane %v1133_v10, 2  ;;  %v190_v16 = vrot.slane %v1135_v11, 2  ;;  %v199_v17 = vadd.f32 %v183_v7, %v1116_v1  ;;  %v200_v18 = vadd.f32 %v184_v8, %v1118_v2 }
  0x44   : > { %170 = vst [vmem:[%s1112_s14 + $0x18] sm:$0xff] %v1122_v4  ;;  %v201_v19 = vadd.f32 %v185_v9, %v1120_v3  ;;  %v202_v20 = vadd.f32 %v186_v12, %v1122_v4  ;;  %v203_v21 = vadd.f32 %v187_v13, %v1124_v5  ;;  %v204_v22 = vadd.f32 %v188_v14, %v1126_v6 }
  0x45   : > { %171 = vst [vmem:[%s1112_s14 + $0x20] sm:$0xff] %v1124_v5  ;;  %v205_v23 = vadd.f32 %v189_v15, %v1133_v10  ;;  %v206_v24 = vadd.f32 %v190_v16, %v1135_v11  ;;  %v207_v25 = vrot.slane %v1116_v1, 4  ;;  %v208_v26 = vrot.slane %v1118_v2, 4 }
  0x46   : > { %172 = vst [vmem:[%s1112_s14 + $0x28] sm:$0xff] %v1126_v6  ;;  %v209_v27 = vrot.slane %v1120_v3, 4  ;;  %v210_v28 = vrot.slane %v1122_v4, 4  ;;  %v211_v29 = vrot.slane %v1124_v5, 4  ;;  %v212_v30 = vrot.slane %v1126_v6, 4 }
  0x47   : > { %173 = vst [vmem:[%s1112_s14 + $0x30] sm:$0xff] %v1133_v10  ;;  %v213_v31 = vrot.slane %v1133_v10, 4  ;;  %v214_v32 = vrot.slane %v1135_v11, 4  ;;  %v223_v33 = vadd.f32 %v207_v25, %v199_v17  ;;  %v224_v34 = vadd.f32 %v208_v26, %v200_v18 }
  0x48   : > { %174 = vst [vmem:[%s1112_s14 + $0x38] sm:$0xff] %v1135_v11  ;;  %v225_v35 = vadd.f32 %v209_v27, %v201_v19  ;;  %v226_v36 = vadd.f32 %v210_v28, %v202_v20  ;;  %v227_v37 = vadd.f32 %v211_v29, %v203_v21  ;;  %v228_v38 = vadd.f32 %v212_v30, %v204_v22 }
  0x49   : > { %v229_v39 = vadd.f32 %v213_v31, %v205_v23  ;;  %v230_v40 = vadd.f32 %v214_v32, %v206_v24  ;;  %v231_v41 = vrot.slane %v1116_v1, 6  ;;  %v232_v42 = vrot.slane %v1118_v2, 6 }
  0x4a   : > { %v233_v43 = vrot.slane %v1120_v3, 6  ;;  %v234_v44 = vrot.slane %v1122_v4, 6  ;;  %v235_v45 = vrot.slane %v1124_v5, 6  ;;  %v236_v46 = vrot.slane %v1126_v6, 6 }
  0x4b   : > { %v237_v47 = vrot.slane %v1133_v10, 6  ;;  %v238_v48 = vrot.slane %v1135_v11, 6  ;;  %v247_v49 = vadd.f32 %v231_v41, %v223_v33  ;;  %v248_v50 = vadd.f32 %v232_v42, %v224_v34 }
  0x4c   : > { %v249_v51 = vadd.f32 %v233_v43, %v225_v35  ;;  %v250_v52 = vadd.f32 %v234_v44, %v226_v36  ;;  %v251_v53 = vadd.f32 %v235_v45, %v227_v37  ;;  %v252_v54 = vadd.f32 %v236_v46, %v228_v38 }
  0x4d   : > { %v253_v55 = vadd.f32 %v237_v47, %v229_v39  ;;  %v254_v56 = vadd.f32 %v238_v48, %v230_v40  ;;  %v1180_v57 = vmul.f32 0.25, %v247_v49  ;;  %v1182_v58 = vmul.f32 0.25, %v248_v50 }
  0x4e   : > { %v1184_v59 = vmul.f32 0.25, %v249_v51  ;;  %v1186_v60 = vmul.f32 0.25, %v250_v52  ;;  %v1188_v61 = vmul.f32 0.25, %v251_v53  ;;  %v1190_v62 = vmul.f32 0.25, %v252_v54 }
  0x4f   : > { %v1192_v63 = vmul.f32 0.25, %v253_v55  ;;  %v1194_v0 = vmul.f32 0.25, %v254_v56  ;;  %v263_v7 = vsub.f32 %v1116_v1, %v1180_v57  ;;  %v264_v8 = vsub.f32 %v1118_v2, %v1182_v58 }
  0x50   : > { %v265_v9 = vsub.f32 %v1120_v3, %v1184_v59  ;;  %v266_v12 = vsub.f32 %v1122_v4, %v1186_v60  ;;  %v267_v13 = vsub.f32 %v1124_v5, %v1188_v61  ;;  %v268_v14 = vsub.f32 %v1126_v6, %v1190_v62 }
  0x51   : > { %v269_v15 = vsub.f32 %v1133_v10, %v1192_v63  ;;  %v270_v16 = vsub.f32 %v1135_v11, %v1194_v0  ;;  %v271_v17 = vmul.f32 %v263_v7, %v263_v7  ;;  %v272_v18 = vmul.f32 %v264_v8, %v264_v8 }
  0x52   : > { %v273_v19 = vmul.f32 %v265_v9, %v265_v9  ;;  %v274_v20 = vmul.f32 %v266_v12, %v266_v12  ;;  %v275_v21 = vmul.f32 %v267_v13, %v267_v13  ;;  %v276_v22 = vmul.f32 %v268_v14, %v268_v14 }
  0x53   : > { %v277_v23 = vmul.f32 %v269_v15, %v269_v15  ;;  %v278_v24 = vmul.f32 %v270_v16, %v270_v16  ;;  %v287_v25 = vrot.slane %v1180_v57, 6  ;;  %v288_v26 = vrot.slane %v1182_v58, 6 }
  0x54   : > { %v289_v27 = vrot.slane %v1184_v59, 6  ;;  %v290_v28 = vrot.slane %v1186_v60, 6  ;;  %v291_v29 = vrot.slane %v1188_v61, 6  ;;  %v292_v30 = vrot.slane %v1190_v62, 6 }
  0x55   : > { %v293_v31 = vrot.slane %v1192_v63, 6  ;;  %v294_v32 = vrot.slane %v1194_v0, 6  ;;  %v303_v33 = vsub.f32 %v1116_v1, %v287_v25  ;;  %v304_v34 = vsub.f32 %v1118_v2, %v288_v26 }
  0x56   : > { %v305_v35 = vsub.f32 %v1120_v3, %v289_v27  ;;  %v306_v36 = vsub.f32 %v1122_v4, %v290_v28  ;;  %v307_v37 = vsub.f32 %v1124_v5, %v291_v29  ;;  %v308_v38 = vsub.f32 %v1126_v6, %v292_v30 }
  0x57   : > { %v309_v39 = vsub.f32 %v1133_v10, %v293_v31  ;;  %v310_v40 = vsub.f32 %v1135_v11, %v294_v32  ;;  %v311_v41 = vmul.f32 %v303_v33, %v303_v33  ;;  %v312_v42 = vmul.f32 %v304_v34, %v304_v34 }
  0x58   : > { %v313_v43 = vmul.f32 %v305_v35, %v305_v35  ;;  %v314_v44 = vmul.f32 %v306_v36, %v306_v36  ;;  %v315_v45 = vmul.f32 %v307_v37, %v307_v37  ;;  %v316_v46 = vmul.f32 %v308_v38, %v308_v38 }
  0x59   : > { %v317_v47 = vmul.f32 %v309_v39, %v309_v39  ;;  %v318_v48 = vmul.f32 %v310_v40, %v310_v40  ;;  %v327_v49 = vrot.slane %v311_v41, 2  ;;  %v328_v50 = vrot.slane %v312_v42, 2 }
  0x5a   : > { %v329_v51 = vrot.slane %v313_v43, 2  ;;  %v330_v52 = vrot.slane %v314_v44, 2  ;;  %v331_v53 = vrot.slane %v315_v45, 2  ;;  %v332_v54 = vrot.slane %v316_v46, 2 }
  0x5b   : > { %v333_v55 = vrot.slane %v317_v47, 2  ;;  %v334_v56 = vrot.slane %v318_v48, 2  ;;  %v343_v7 = vadd.f32 %v327_v49, %v271_v17  ;;  %v344_v8 = vadd.f32 %v328_v50, %v272_v18 }
  0x5c   : > { %v345_v9 = vadd.f32 %v329_v51, %v273_v19  ;;  %v346_v12 = vadd.f32 %v330_v52, %v274_v20  ;;  %v347_v13 = vadd.f32 %v331_v53, %v275_v21  ;;  %v348_v14 = vadd.f32 %v332_v54, %v276_v22 }
  0x5d   : > { %v349_v15 = vadd.f32 %v333_v55, %v277_v23  ;;  %v350_v16 = vadd.f32 %v334_v56, %v278_v24  ;;  %v351_v25 = vrot.slane %v1180_v57, 4  ;;  %v352_v26 = vrot.slane %v1182_v58, 4 }
  0x5e   : > { %v353_v27 = vrot.slane %v1184_v59, 4  ;;  %v354_v28 = vrot.slane %v1186_v60, 4  ;;  %v355_v29 = vrot.slane %v1188_v61, 4  ;;  %v356_v30 = vrot.slane %v1190_v62, 4 }
  0x5f   : > { %v357_v17 = vrot.slane %v1192_v63, 4  ;;  %v358_v18 = vrot.slane %v1194_v0, 4  ;;  %v367_v19 = vsub.f32 %v1116_v1, %v351_v25  ;;  %v368_v20 = vsub.f32 %v1118_v2, %v352_v26 }
  0x60   : > { %v369_v21 = vsub.f32 %v1120_v3, %v353_v27  ;;  %v370_v22 = vsub.f32 %v1122_v4, %v354_v28  ;;  %v371_v23 = vsub.f32 %v1124_v5, %v355_v29  ;;  %v372_v24 = vsub.f32 %v1126_v6, %v356_v30 }
  0x61   : > { %v373_v31 = vsub.f32 %v1133_v10, %v357_v17  ;;  %v374_v32 = vsub.f32 %v1135_v11, %v358_v18  ;;  %v375_v33 = vmul.f32 %v367_v19, %v367_v19  ;;  %v376_v34 = vmul.f32 %v368_v20, %v368_v20 }
  0x62   : > { %v377_v35 = vmul.f32 %v369_v21, %v369_v21  ;;  %v378_v36 = vmul.f32 %v370_v22, %v370_v22  ;;  %v379_v37 = vmul.f32 %v371_v23, %v371_v23  ;;  %v380_v38 = vmul.f32 %v372_v24, %v372_v24 }
  0x63   : > { %v381_v39 = vmul.f32 %v373_v31, %v373_v31  ;;  %v382_v40 = vmul.f32 %v374_v32, %v374_v32  ;;  %v391_v41 = vrot.slane %v375_v33, 4  ;;  %v392_v42 = vrot.slane %v376_v34, 4 }
  0x64   : > { %v393_v43 = vrot.slane %v377_v35, 4  ;;  %v394_v44 = vrot.slane %v378_v36, 4  ;;  %v395_v45 = vrot.slane %v379_v37, 4  ;;  %v396_v46 = vrot.slane %v380_v38, 4 }
  0x65   : > { %v397_v47 = vrot.slane %v381_v39, 4  ;;  %v398_v48 = vrot.slane %v382_v40, 4  ;;  %v407_v49 = vadd.f32 %v391_v41, %v343_v7  ;;  %v408_v50 = vadd.f32 %v392_v42, %v344_v8 }
  0x66   : > { %v409_v51 = vadd.f32 %v393_v43, %v345_v9  ;;  %v410_v52 = vadd.f32 %v394_v44, %v346_v12  ;;  %v411_v53 = vadd.f32 %v395_v45, %v347_v13  ;;  %v412_v54 = vadd.f32 %v396_v46, %v348_v14 }
  0x67   : > { %v413_v55 = vadd.f32 %v397_v47, %v349_v15  ;;  %v414_v56 = vadd.f32 %v398_v48, %v350_v16  ;;  %v415_v25 = vrot.slane %v1180_v57, 2  ;;  %v416_v26 = vrot.slane %v1182_v58, 2 }
  0x68   : > { %v417_v27 = vrot.slane %v1184_v59, 2  ;;  %v418_v28 = vrot.slane %v1186_v60, 2  ;;  %v419_v29 = vrot.slane %v1188_v61, 2  ;;  %v420_v30 = vrot.slane %v1190_v62, 2 }
  0x69   : > { %v421_v7 = vrot.slane %v1192_v63, 2  ;;  %v422_v8 = vrot.slane %v1194_v0, 2  ;;  %v431_v9 = vsub.f32 %v1116_v1, %v415_v25  ;;  %v432_v12 = vsub.f32 %v1118_v2, %v416_v26 }
  0x6a   : > { %v433_v57 = vsub.f32 %v1120_v3, %v417_v27  ;;  %v434_v58 = vsub.f32 %v1122_v4, %v418_v28  ;;  %v435_v59 = vsub.f32 %v1124_v5, %v419_v29  ;;  %v436_v60 = vsub.f32 %v1126_v6, %v420_v30 }
  0x6b   : > { %v437_v61 = vsub.f32 %v1133_v10, %v421_v7  ;;  %v438_v62 = vsub.f32 %v1135_v11, %v422_v8  ;;  %v439_v13 = vmul.f32 %v431_v9, %v431_v9  ;;  %v440_v63 = vmul.f32 %v432_v12, %v432_v12 }
  0x6c   : > { %v441_v14 = vmul.f32 %v433_v57, %v433_v57  ;;  %v442_v0 = vmul.f32 %v434_v58, %v434_v58  ;;  %v443_v15 = vmul.f32 %v435_v59, %v435_v59  ;;  %v444_v1 = vmul.f32 %v436_v60, %v436_v60 }
  0x6d   : > { %v445_v16 = vmul.f32 %v437_v61, %v437_v61  ;;  %v446_v2 = vmul.f32 %v438_v62, %v438_v62  ;;  %v455_v17 = vrot.slane %v439_v13, 6  ;;  %v456_v3 = vrot.slane %v440_v63, 6 }
  0x6e   : > { %v457_v18 = vrot.slane %v441_v14, 6  ;;  %v458_v4 = vrot.slane %v442_v0, 6  ;;  %v459_v19 = vrot.slane %v443_v15, 6  ;;  %v460_v5 = vrot.slane %v444_v1, 6 }
  0x6f   : > { %v461_v20 = vrot.slane %v445_v16, 6  ;;  %v462_v6 = vrot.slane %v446_v2, 6  ;;  %v471_v21 = vadd.f32 %v455_v17, %v407_v49  ;;  %v472_v10 = vadd.f32 %v456_v3, %v408_v50 }
  0x70   : > { %v473_v22 = vadd.f32 %v457_v18, %v409_v51  ;;  %v474_v11 = vadd.f32 %v458_v4, %v410_v52  ;;  %v475_v23 = vadd.f32 %v459_v19, %v411_v53  ;;  %v476_v24 = vadd.f32 %v460_v5, %v412_v54 }
  0x71   : > { %v477_v31 = vadd.f32 %v461_v20, %v413_v55  ;;  %v478_v32 = vadd.f32 %v462_v6, %v414_v56  ;;  %v479_v33 = vmul.f32 0.25, %v471_v21  ;;  %v480_v34 = vmul.f32 0.25, %v472_v10 }
  0x72   : > { %v481_v35 = vmul.f32 0.25, %v473_v22  ;;  %v482_v36 = vmul.f32 0.25, %v474_v11  ;;  %v483_v37 = vmul.f32 0.25, %v475_v23  ;;  %v484_v38 = vmul.f32 0.25, %v476_v24 }
  0x73   : > { %v485_v39 = vmul.f32 0.25, %v477_v31  ;;  %v1260_v40 = vadd.f32 0.0001, %v479_v33  ;;  %v1262_v41 = vadd.f32 0.0001, %v480_v34  ;;  %v486_v44 = vmul.f32 0.25, %v478_v32 }
  0x74   : > { %v1264_v42 = vadd.f32 0.0001, %v481_v35  ;;  %v1266_v43 = vadd.f32 0.0001, %v482_v36  ;;  %v1268_v45 = vadd.f32 0.0001, %v483_v37 }
  0x75   : > { %833 = vrsqrt.f32 %v1260_v40  ;;  %v1271_v46 = vadd.f32 0.0001, %v484_v38  ;;  %v1274_v47 = vadd.f32 0.0001, %v485_v39  ;;  %v1278_v48 = vadd.f32 0.0001, %v486_v44 }
  0x76   : > { %835 = vrsqrt.f32 %v1262_v41  ;;  %vm502_vm1 = vcmp.eq.f32.partialorder %v1260_v40, inf  ;;  %v505_v53 = vand.u32 2147483648, %v1260_v40  ;;  %vm504_vm2 = vcmp.eq.f32.partialorder %v1260_v40, 0.0 }
  0x77   : > { %837 = vrsqrt.f32 %v1264_v42  ;;  %vm514_vm3 = vcmp.eq.f32.partialorder %v1262_v41, inf  ;;  %v517_v25 = vand.u32 2147483648, %v1262_v41  ;;  %vm516_vm4 = vcmp.eq.f32.partialorder %v1262_v41, 0.0 }
  0x78   : > { %839 = vrsqrt.f32 %v1266_v43  ;;  %vm526_vm5 = vcmp.eq.f32.partialorder %v1264_v42, inf  ;;  %v529_v29 = vand.u32 2147483648, %v1264_v42  ;;  %v541_v7 = vand.u32 2147483648, %v1266_v43 }
  0x79   : > { %841 = vrsqrt.f32 %v1268_v45  ;;  %vm528_vm6 = vcmp.eq.f32.partialorder %v1264_v42, 0.0  ;;  %vm538_vm7 = vcmp.eq.f32.partialorder %v1266_v43, inf  ;;  %v553_v58 = vand.u32 2147483648, %v1268_v45 }
  0x7a   : > { %843 = vrsqrt.f32 %v1271_v46  ;;  %vm540_vm8 = vcmp.eq.f32.partialorder %v1266_v43, 0.0  ;;  %vm550_vm9 = vcmp.eq.f32.partialorder %v1268_v45, inf  ;;  %v565_v13 = vand.u32 2147483648, %v1271_v46 }
  0x7b   : > { %v834_v49 = vpop.eup %833  ;;  %845 = vrsqrt.f32 %v1274_v47  ;;  %vm562_vm10 = vcmp.eq.f32.partialorder %v1271_v46, inf  ;;  %vm552_vm11 = vcmp.eq.f32.partialorder %v1268_v45, 0.0  ;;  %vm574_vm13 = vcmp.eq.f32.partialorder %v1274_v47, inf }
  0x7c   : > { %v836_v50 = vpop.eup %835  ;;  %v496_v51 = vmul.f32 %v834_v49, %v1260_v40  ;;  %847 = vrsqrt.f32 %v1278_v48  ;;  %vm564_vm14 = vcmp.eq.f32.partialorder %v1271_v46, 0.0  ;;  %vm576_vm15 = vcmp.eq.f32.partialorder %v1274_v47, 0.0 }
  0x7d   : > { %v838_v52 = vpop.eup %837  ;;  %v508_v54 = vmul.f32 %v836_v50, %v1262_v41  ;;  %vm586_vm0 = vcmp.eq.f32.partialorder %v1278_v48, inf }
  0x7e   : > { %v840_v55 = vpop.eup %839  ;;  %v497_v56 = vmul.f32 %v834_v49, %v496_v51  ;;  %v520_v26 = vmul.f32 %v838_v52, %v1264_v42 }
  0x7f   : > { %v842_v27 = vpop.eup %841  ;;  %v509_v28 = vmul.f32 %v836_v50, %v508_v54  ;;  %v532_v30 = vmul.f32 %v840_v55, %v1266_v43 }
  0x80   : > { %v844_v8 = vpop.eup %843  ;;  %v498_v9 = vmul.f32 0.5, %v497_v56  ;;  %v521_v12 = vmul.f32 %v838_v52, %v520_v26  ;;  %v544_v57 = vmul.f32 %v842_v27, %v1268_v45 }
  0x81   : > { %v846_v59 = vpop.eup %845  ;;  %v510_v60 = vmul.f32 0.5, %v509_v28  ;;  %v533_v61 = vmul.f32 %v840_v55, %v532_v30  ;;  %v556_v62 = vmul.f32 %v844_v8, %v1271_v46  ;;  %v577_v30 = vand.u32 2147483648, %v1274_v47 }
  0x82   : > { %v499_v63 = vsub.f32 1.5, %v498_v9  ;;  %v522_v14 = vmul.f32 0.5, %v521_v12  ;;  %v545_v0 = vmul.f32 %v842_v27, %v544_v57  ;;  %v568_v15 = vmul.f32 %v846_v59, %v1274_v47  ;;  %v848_v1 = vpop.eup %847 }
  0x83   : > { %v511_v16 = vsub.f32 1.5, %v510_v60  ;;  %v534_v2 = vmul.f32 0.5, %v533_v61  ;;  %v557_v17 = vmul.f32 %v844_v8, %v556_v62  ;;  %v580_v21 = vmul.f32 %v848_v1, %v1278_v48 }
  0x84   : > { %v500_v3 = vmul.f32 %v834_v49, %v499_v63  ;;  %v523_v18 = vsub.f32 1.5, %v522_v14  ;;  %v546_v4 = vmul.f32 0.5, %v545_v0  ;;  %v569_v19 = vmul.f32 %v846_v59, %v568_v15 }
  0x85   : > { %v512_v5 = vmul.f32 %v836_v50, %v511_v16  ;;  %v535_v20 = vsub.f32 1.5, %v534_v2  ;;  %v558_v6 = vmul.f32 0.5, %v557_v17  ;;  %v581_v33 = vmul.f32 %v848_v1, %v580_v21  ;;  %v591_v17 = vld [vmem:[#allocation2] sm:$0x3] }
  0x86   : > { %v501_v10 = vmul.f32 %v500_v3, %v1260_v40  ;;  %v524_v22 = vmul.f32 %v838_v52, %v523_v18  ;;  %v547_v11 = vsub.f32 1.5, %v546_v4  ;;  %v570_v23 = vmul.f32 0.5, %v569_v19 }
  0x87   : > { %v513_v24 = vmul.f32 %v512_v5, %v1262_v41  ;;  %v536_v31 = vmul.f32 %v840_v55, %v535_v20  ;;  %v559_v32 = vsub.f32 1.5, %v558_v6  ;;  %v582_v56 = vmul.f32 0.5, %v581_v33 }
  0x88   : > { %v503_v34 = vsel %vm502_vm1, %v1260_v40, %v501_v10  ;;  %v525_v35 = vmul.f32 %v524_v22, %v1264_v42  ;;  %v548_v36 = vmul.f32 %v842_v27, %v547_v11  ;;  %v571_v37 = vsub.f32 1.5, %v570_v23 }
  0x89   : > { %v506_v38 = vsel %vm504_vm2, %v505_v53, %v503_v34  ;;  %v515_v39 = vsel %vm514_vm3, %v1262_v41, %v513_v24  ;;  %v537_v44 = vmul.f32 %v536_v31, %v1266_v43  ;;  %v560_v49 = vmul.f32 %v844_v8, %v559_v32 }
  0x8a   : > { %v518_v50 = vsel %vm516_vm4, %v517_v25, %v515_v39  ;;  %v527_v51 = vsel %vm526_vm5, %v1264_v42, %v525_v35  ;;  %v549_v52 = vmul.f32 %v548_v36, %v1268_v45  ;;  %v572_v54 = vmul.f32 %v846_v59, %v571_v37 }
  0x8b   : > { %v530_v40 = vsel %vm528_vm6, %v529_v29, %v527_v51  ;;  %v539_v53 = vsel %vm538_vm7, %v1266_v43, %v537_v44  ;;  %v561_v55 = vmul.f32 %v560_v49, %v1271_v46  ;;  %v593_v27 = vsel %vm592_vm12, %v506_v38, 0.0 }
  0x8c   : > { %v542_v41 = vsel %vm540_vm8, %v541_v7, %v539_v53  ;;  %v551_v25 = vsel %vm550_vm9, %v1268_v45, %v549_v52  ;;  %v573_v26 = vmul.f32 %v572_v54, %v1274_v47  ;;  %v583_v28 = vsub.f32 1.5, %v582_v56 }
  0x8d   : > { %v563_v42 = vsel %vm562_vm10, %v1271_v46, %v561_v55  ;;  %v594_v29 = vsel %vm592_vm12, %v518_v50, 0.0  ;;  %v554_v43 = vsel %vm552_vm11, %v553_v58, %v551_v25  ;;  %v596_v8 = vsel %vm592_vm12, %v530_v40, 0.0 }
  0x8e   : > { %v595_v7 = vadd.f32 %v594_v29, %v593_v27  ;;  %v575_v9 = vsel %vm574_vm13, %v1274_v47, %v573_v26  ;;  %v584_v12 = vmul.f32 %v848_v1, %v583_v28  ;;  %v598_v46 = vsel %vm592_vm12, %v542_v41, 0.0 }
  0x8f   : > { %v566_v57 = vsel %vm564_vm14, %v565_v13, %v563_v42  ;;  %v589_v45 = vand.u32 2147483648, %v1278_v48  ;;  %vm588_vm1 = vcmp.eq.f32.partialorder %v1278_v48, 0.0  ;;  %v600_v60 = vsel %vm592_vm12, %v554_v43, 0.0 }
  0x90   : > { %v597_v58 = vadd.f32 %v596_v8, %v595_v7  ;;  %v585_v59 = vmul.f32 %v584_v12, %v1278_v48  ;;  %v578_v61 = vsel %vm576_vm15, %v577_v30, %v575_v9  ;;  %v602_v47 = vsel %vm592_vm12, %v566_v57, 0.0 }
  0x91   : > { %v604_v13 = vsel %vm592_vm12, %v578_v61, 0.0  ;;  %vm611_vm2 = vcmask 1024  }
  0x92   : > { %v599_v62 = vadd.f32 %v598_v46, %v597_v58  ;;  %v587_v63 = vsel %vm586_vm0, %v1278_v48, %v585_v59 }
  0x93   : > { %v590_v14 = vsel %vm588_vm1, %v589_v45, %v587_v63 }
  0x94   : > { %v601_v0 = vadd.f32 %v600_v60, %v599_v62  ;;  %v606_v1 = vsel %vm592_vm12, %v590_v14, 0.0 }
  0x96   : > { %v603_v15 = vadd.f32 %v602_v47, %v601_v0 }
  0x98   : > { %v605_v16 = vadd.f32 %v604_v13, %v603_v15 }
  0x9a   : > { %v607_v2 = vadd.f32 %v606_v1, %v605_v16 }
  0x9c   : > { %608 = vadd.xlane.f32.xlu0 %v607_v2 }
 0x10f   : > { %v609_v3 = vpop.xlane.xlu0 %608 }
 0x110   : > { %v610_v18 = vadd.f32 %v609_v3, %v591_v17 }
 0x112   : > { %612 = vst.msk [vmem:[#allocation2] sm:$0x3] %vm611_vm2, %v610_v18 }
 0x113 PF: > { %p750_p8 = scmp.lt.s32.totalorder %s1030_s13, 1 }
 0x115   : > { %616 = sbr.rel (%p750_p8) target bundleno = 413 (0x19d), region = 40 }
 0x11a   : > { %v617_v48 = vld [vmem:[#allocation2] sm:$0x3]  ;;  %v984_v4 = vmov 0   ;;  %vm626_vm3 = vcmask 1041408   ;;  %vm628_vm4 = vcmask 1043456   ;;  %vm630_vm5 = vcmask 1045504  }
 0x11b   : > { %849 = vset.pattern.permute.xlu0 %v984_v4  ;;  %v618_v19 = vmul.f32 0.0009765625, %v617_v48 }
 0x11d   : > { %v620_v5 = vrot.slane %v618_v19, 6  ;;  %v622_v20 = vrot.slane %v618_v19, 4  ;;  %v624_v6 = vrot.slane %v618_v19, 2 }
 0x11f   : > { %v627_v21 = vsel %vm626_vm3, %v618_v19, %v620_v5 }
 0x120   : > { %v629_v10 = vsel %vm628_vm4, %v627_v21, %v622_v20 }
 0x121   : > { %v631_v22 = vsel %vm630_vm5, %v629_v10, %v624_v6 }
 0x122   : > { %634 = vperm.xlu0 %849, %v631_v22  }
 0x194   : > { %v635_v11 = vpop.permute.xlu0 %634 }
 0x195   : > { %637 = vst [vmem:[%s1112_s14] sm:$0xff] %v635_v11 }
 0x196   : > { %638 = vst [vmem:[%s1112_s14 + $0x8] sm:$0xff] %v635_v11 }
 0x197   : > { %639 = vst [vmem:[%s1112_s14 + $0x10] sm:$0xff] %v635_v11 }
 0x198   : > { %640 = vst [vmem:[%s1112_s14 + $0x18] sm:$0xff] %v635_v11 }
 0x199   : > { %641 = vst [vmem:[%s1112_s14 + $0x20] sm:$0xff] %v635_v11 }
 0x19a   : > { %642 = vst [vmem:[%s1112_s14 + $0x28] sm:$0xff] %v635_v11 }
 0x19b   : > { %643 = vst [vmem:[%s1112_s14 + $0x30] sm:$0xff] %v635_v11 }
 0x19c   : > { %644 = vst [vmem:[%s1112_s14 + $0x38] sm:$0xff] %v635_v11 }
 0x19d PF: > { %s1377_s23 = scalar_lea.sflag [#allocation5], %s138_s5  ;;  %652 = sbr.rel (!%p1069_p1) target bundleno = 448 (0x1c0), region = 44 }
 0x19e   : > { %s752_s16 = sshll.u32 (%p1069_p1), %s1030_s13, 3 }
 0x19f   : > { %s654_s18 = ssub.s32 (%p1069_p1), 10, %s752_s16 }
 0x1a0   : > { %p655_p5 = scmp.lt.s32.totalorder (%p1069_p1), %s654_s18, 8 }
 0x1a2   : > { %s1457_s18 = smov (!%p655_p5, %s654_s18), 8 }
 0x1a3   : > { %s753_s19 = sshll.u32 %s1457_s18, 3 }
 0x1a4   : > { %s658_s17 = ssub.s32 64, %s753_s19 }
 0x1a5   : > { %s659_s21 = sshll.u32 %s658_s17, 4 }
 0x1a6   : > { %660 = vsyncadd %s1377_s23, %s659_s21  ;;  %p1386_p7 = scmp.ne.s32.totalorder %s753_s19, 0  ;;  %s761_s26 = sshll.u32 %s1030_s13, 6 }
 0x1a7   : > { %s663_s30 = scalar_lea.hbm %s1441_s1, %s761_s26  ;;  %s757_s28 = sshll.u32 %s1457_s18, 7 }
 0x1a8   : > { %s666_s2 = sshll.u32 %s1112_s14, 4  ;;  %s668_s3 = sshll.u32 %s663_s30, 4  ;;  %s667_s2 = int_to_ptr.vmem [resolvable:$true] %s666_s2  ;;  %s669_s3 = int_to_ptr.hbm [resolvable:$true] %s668_s3 }
 0x1a9   : > { %s880_s4 = sshra.s32 %s667_s2, 4  ;;  %s882_s5 = sshrl.u32 %s757_s28, 4  ;;  %s881_s4 = int_to_ptr.vmem [resolvable:$true] %s880_s4 }
 0x1aa   : > { %s887_s9 = scalar_lea.vmem %s881_s4, %s882_s5  ;;  %s985_s16 = smov [#allocation6]  }
 0x1ab   : > { %p888_p1 = scmp.ne.s32.totalorder %s881_s4, %s887_s9  ;;  %s891_s13 = scalar_lea.vmem %s985_s16, 128 }
 0x1ac   : > { %p893_p12 = scmp.lt.s32.totalorder %s891_s13, %s887_s9 }
 0x1ad   : > { %p889_p10 = pnand %p888_p1, %p1386_p7 }
 0x1af   : > { %p890_p11 = pneg %p889_p10 }
 0x1b1   : > { %p895_p6 = pnand %p893_p12, %p890_p11 }
 0x1b3   : > { %898 = shalt.err (!%p895_p6)
}
 0x1b4   : > { %s899_s19 = sshra.s32 %s669_s3, 4  ;;  %s910_s26 = scalar_lea.hbm %s1441_s1, 80  ;;  %s900_s19 = int_to_ptr.hbm [resolvable:$true] %s899_s19 }
 0x1b5   : > { %s906_s14 = scalar_lea.hbm %s900_s19, %s882_s5  ;;  %p911_p0 = scmp.lt.s32.totalorder %s900_s19, %s1441_s1 }
 0x1b6   : > { %p907_p13 = scmp.ne.s32.totalorder %s900_s19, %s906_s14  ;;  %p912_p4 = scmp.lt.s32.totalorder %s910_s26, %s906_s14 }
 0x1b8   : > { %p908_p2 = pnand %p907_p13, %p1386_p7  ;;  %p913_p8 = por %p912_p4, %p911_p0 }
 0x1ba   : > { %p909_p9 = pneg %p908_p2 }
 0x1bc   : > { %p914_p5 = pnand %p913_p8, %p909_p9 }
 0x1be   : > { %917 = shalt.err (!%p914_p5)
}
 0x1bf   : > { %671 = dma.vmem_to_hbm [thread:$0]  (%p1386_p7), %s667_s2, %s757_s28, %s669_s3, %s1377_s23  }
 0x1c0 PF: > { %s680_s30 = sand.u32 1, %s957_s6   ;;  %p1448_p1 = scmp.ge.s32.totalorder %s981_s12, 2 }
 0x1c1   : > { %s681_s4 = scalar_lea.sflag [#allocation5], %s680_s30 }
 0x1c2   : > { %p770_p10 = pnand %p1448_p1, %p1074_p3 }
 0x1c4   : > { %p771_p11 = pneg %p770_p10 }
 0x1c6   : > { %952 = dma.done.wait (%p771_p11), %s681_s4, 1024  }
 0x1c7   : > { %954 = vsyncadd (%p771_p11), %s681_s4, 4294966272  ;;  %p14_p7 = scmp.ge.s32.totalorder %s1034_s15, 4   ;;  %s1449_s6 = smov %s961_s7 }
 0x1c8   : > { %s1450_s7 = smov %s965_s8  ;;  %s1451_s8 = smov %s1063_s25 }
 0x1c9   : > { %s1452_s9 = smov %s973_s10  ;;  %s1453_s10 = smov %s977_s11 }
 0x1ca   : > { %s1454_s11 = smov %s1053_s22  ;;  %s1455_s12 = smov %s1034_s15 }
 0x1cb   :  { %16 = sbr.rel (!%p14_p7) target bundleno = 7 (0x7), region = 81 }
 0x1d0   :  { %687 = vsyncpa [#allocation4], 1 }
 0x1d1   :  { %689 = vsyncpa [#allocation4 + $0x1], 1 }
 0x1d2   :  { %690 = vsyncpa [#allocation5], 1 }
 0x1d3   :  { %692 = vsyncpa [#allocation5 + $0x1], 1 }

</bundles_post_ra>
